<compile_context>
chip_gen: v7x
topology: tpu7x:2x2x1
jax: 0.10.0
libtpu: 0.0.40
codegen_flags: <defaults>
</compile_context>

<pallas_src>
import functools

import jax
import jax.numpy as jnp
from jax import lax
from jax.experimental import pallas as pl
from jax.experimental.pallas import tpu as pltpu


def _crelu_gemm_kernel(p_ref, w_ref, s_ref, b_ref, o_ref):
    """One (batch, row-tile) grid step: a single lane-dense GEMM + f32 epilogue.

    p_ref: (tile_h, Wo, F_pad)   im2col patches, bf16 (auto-pipelined)
    w_ref: (F_pad, Cout2)        [W; -W] in GEMM form, bf16 (resident across steps)
    s_ref: (1, Cout2)            per-channel scale (alpha * inv_std), f32
    b_ref: (1, Cout2)            per-channel bias (BN shift + Scale beta), f32
    o_ref: (tile_h, Wo, Cout2)   unpadded bf16 output tile
    """
    tile_h, wo, f_pad = p_ref.shape
    cout2 = w_ref.shape[-1]
    rows = tile_h * wo

    # Leading-dim merge only (lane dim unchanged) -> no relayout.
    patches = p_ref[...].reshape(rows, f_pad)
    # Single MXU push chain per step: (rows, 128) x (128, Cout2), f32 accumulate.
    acc = jnp.dot(patches, w_ref[...], preferred_element_type=jnp.float32)
    # BN scale + Scale(alpha,beta) + ReLU in f32 (v5e VPU has no bf16); cast only at the store.
    acc = acc * s_ref[...] + b_ref[...]
    acc = jnp.maximum(acc, 0.0)
    # Leading-dim split only (lane dim unchanged) -> no relayout; bf16 writeback.
    o_ref[...] = acc.reshape(tile_h, wo, cout2).astype(o_ref.dtype)


def _vmem_budget_bytes():
    """~75% of this generation's physical VMEM (96 MiB on v5e/v6e, 48 MiB on v7x);
    conservative 48 MiB fallback if the hardware query is unavailable."""
    try:
        cap = getattr(pltpu.get_tpu_info(), "vmem_capacity_bytes", None)
        if cap:
            return int(cap) * 3 // 4
    except Exception:
        pass
    return 48 * 1024 * 1024


def _pick_tile_h(Ho, Wo, F_pad, Cout2, budget_bytes):
    """Largest divisor of Ho whose double-buffered input+output blocks fit the VMEM budget."""
    out_lanes = -(-Cout2 // 128) * 128          # bf16 out block pads its lane dim in VMEM
    budget = budget_bytes - F_pad * out_lanes * 2 - (1 << 20)   # resident weights + headroom
    best = 0
    for t in range(1, Ho + 1):
        if Ho % t:
            continue
        need = 2 * t * Wo * F_pad * 2 + 2 * t * Wo * out_lanes * 2   # double-buffered blocks
        if need <= budget:
            best = t
    if best == 0:
        # TODO(synk): add a Wo (column) tile dimension for very wide images / large Cin.
        raise ValueError("row tile does not fit the VMEM budget; column tiling not implemented")
    return best


def conv2d_crelu_pallas(x, weight, conv_bias, running_mean, running_var,
                        alpha, beta, *, stride=1, same_padding=False,
                        eps=1e-5, tile_h=None):
    """Forward of Conv2d_CReLU (eval-mode BatchNorm).

    x:            (B, Cin, H, W)       NCHW (PyTorch layout)
    weight:       (Cout, Cin, K, K)    OIHW
    conv_bias:    (Cout,) or None      (module default: bias=False -> None)
    running_mean: (Cout,)              BatchNorm2d running statistics (eval mode)
    running_var:  (Cout,)
    alpha, beta:  (2*Cout,)            Scale params over the CReLU-doubled channels
    returns       (B, 2*Cout, Ho, Wo)  NCHW, x.dtype
    """
    B, Cin, H, W = x.shape
    Cout, Cin_w, K, K2 = weight.shape
    assert Cin == Cin_w and K == K2
    Cout2 = 2 * Cout
    assert alpha.shape == (Cout2,) and beta.shape == (Cout2,)

    pad = (K - 1) // 2 if same_padding else 0      # == PyTorch int((k-1)/2), symmetric
    Ho = (H + 2 * pad - K) // stride + 1
    Wo = (W + 2 * pad - K) // stride + 1

    # ---- fold BN(eval) + CReLU + Scale -------------------------------------------------------
    # out[j] = relu( alpha[j] * s[j] * (conv[c] + cb[c] - mu[c]) * inv_std[c] + beta[j] ),
    #   c = j mod Cout, s = +1 for j < Cout and -1 otherwise.
    # The sign is folded into the doubled GEMM weights [W; -W]; the BN scale and bias stay in
    # the f32 epilogue so the bf16 weights keep their original magnitudes.
    # TODO(synk): eval-mode BatchNorm only; training-mode batch stats / running-stat updates
    # are not implemented.
    f32 = jnp.float32
    inv_std = lax.rsqrt(running_var.astype(f32) + eps)                       # (Cout,)
    cb = conv_bias.astype(f32) if conv_bias is not None else jnp.zeros((Cout,), f32)
    base = (cb - running_mean.astype(f32)) * inv_std                         # (Cout,)
    sign = jnp.concatenate([jnp.ones((Cout,), f32), -jnp.ones((Cout,), f32)])
    inv_std2 = jnp.tile(inv_std, 2)                                          # (Cout2,)
    base2 = jnp.tile(base, 2)
    scale_row = (alpha.astype(f32) * inv_std2).reshape(1, Cout2)             # f32
    bias_row = (alpha.astype(f32) * sign * base2 + beta.astype(f32)).reshape(1, Cout2)

    # ---- GEMM weights: [W; -W] -> (K*K*Cin, 2*Cout), zero-padded to 128 contraction lanes ----
    F = K * K * Cin
    F_pad = -(-F // 128) * 128
    w2 = jnp.concatenate([weight.astype(f32), -weight.astype(f32)], axis=0)  # (Cout2,Cin,K,K)
    w_gemm = jnp.transpose(w2, (2, 3, 1, 0)).reshape(F, Cout2)               # (kh,kw,cin)-major
    w_gemm = jnp.pad(w_gemm, ((0, F_pad - F), (0, 0))).astype(jnp.bfloat16)

    # ---- wrapper-side im2col (unit-stride kernel slices even for stride > 1) -----------------
    x_nhwc = jnp.transpose(x, (0, 2, 3, 1)).astype(jnp.bfloat16)             # (B,H,W,Cin)
    x_p = jnp.pad(x_nhwc, ((0, 0), (pad, pad), (pad, pad), (0, 0)))
    taps = []
    for kh in range(K):
        for kw in range(K):
            taps.append(lax.slice(
                x_p, (0, kh, kw, 0),
                (B, kh + (Ho - 1) * stride + 1, kw + (Wo - 1) * stride + 1, Cin),
                (1, stride, stride, 1)))
    patches = jnp.concatenate(taps, axis=-1)                                 # (B,Ho,Wo,F)
    patches = jnp.pad(patches, ((0, 0), (0, 0), (0, 0), (0, F_pad - F)))     # lane-dense 128

    # ---- tiling from a per-generation VMEM budget --------------------------------------------
    vmem_budget = _vmem_budget_bytes()
    if tile_h is None:
        tile_h = _pick_tile_h(Ho, Wo, F_pad, Cout2, vmem_budget)
    assert Ho % tile_h == 0, "tile_h must divide Ho"   # TODO(synk): ragged last row-tile
    n_ht = Ho // tile_h

    flops = 2 * B * Ho * Wo * F_pad * Cout2
    bytes_accessed = (B * Ho * Wo * F_pad * 2 + F_pad * Cout2 * 2
                      + 2 * Cout2 * 4 + B * Ho * Wo * Cout2 * 2)

    out_nhwc = pl.pallas_call(
        _crelu_gemm_kernel,
        out_shape=jax.ShapeDtypeStruct((B, Ho, Wo, Cout2), jnp.bfloat16),
        grid_spec=pltpu.PrefetchScalarGridSpec(
            num_scalar_prefetch=0,
            grid=(B, n_ht),
            in_specs=[
                pl.BlockSpec((pl.Squeezed(), tile_h, Wo, F_pad),
                             lambda b, h: (b, h, 0, 0)),                     # im2col patches
                pl.BlockSpec((F_pad, Cout2), lambda b, h: (0, 0)),           # weights (resident)
                pl.BlockSpec((1, Cout2), lambda b, h: (0, 0)),               # scale
                pl.BlockSpec((1, Cout2), lambda b, h: (0, 0)),               # bias
            ],
            out_specs=pl.BlockSpec((pl.Squeezed(), tile_h, Wo, Cout2),
                                   lambda b, h: (b, h, 0, 0))),
        compiler_params=pltpu.CompilerParams(
            dimension_semantics=("parallel", "parallel"),
            vmem_limit_bytes=vmem_budget),
        cost_estimate=pl.CostEstimate(flops=flops, transcendentals=0,
                                      bytes_accessed=bytes_accessed),
    )(patches, w_gemm, scale_row, bias_row)

    # NHWC bf16 -> NCHW in caller dtype.  Transpose runs on the compact bf16 output; callers
    # that can consume NHWC should take `out_nhwc` directly to skip this epilogue.
    return jnp.transpose(out_nhwc, (0, 3, 1, 2)).astype(x.dtype)


def _reference_conv2d_crelu(x, weight, conv_bias, running_mean, running_var,
                            alpha, beta, *, stride, same_padding, eps=1e-5):
    """Pure-JAX mirror of the PyTorch Conv2d_CReLU forward (eval-mode BN)."""
    K = weight.shape[-1]
    pad = (K - 1) // 2 if same_padding else 0
    y = lax.conv_general_dilated(
        x, weight, window_strides=(stride, stride),
        padding=((pad, pad), (pad, pad)),
        dimension_numbers=("NCHW", "OIHW", "NCHW"))
    if conv_bias is not None:
        y = y + conv_bias.reshape(1, -1, 1, 1)
    y = (y - running_mean.reshape(1, -1, 1, 1)) * lax.rsqrt(
        running_var.reshape(1, -1, 1, 1) + eps)              # BatchNorm2d(affine=False)
    y = jnp.concatenate([y, -y], axis=1)                     # CReLU channel doubling
    y = y * alpha.reshape(1, -1, 1, 1) + beta.reshape(1, -1, 1, 1)   # Scale
    return jnp.maximum(y, 0.0)                               # ReLU


if __name__ == "__main__":
    # Conv2d_CReLU(in_channels=4, out_channels=8, kernel_size=3, stride=1,
    #              same_padding=True, bias=False)
    B, Cin, H, W = 2, 4, 16, 16
    Cout, K, stride = 8, 3, 1
    same_padding = True

    key = jax.random.PRNGKey(0)
    kx, kw, ka, kb, km, kv = jax.random.split(key, 6)
    x = jax.random.normal(kx, (B, Cin, H, W), dtype=jnp.float32)
    weight = jax.random.normal(kw, (Cout, Cin, K, K), dtype=jnp.float32) * 0.1
    alpha = 1.0 + 0.1 * jax.random.normal(ka, (2 * Cout,), dtype=jnp.float32)
    beta = 0.1 * jax.random.normal(kb, (2 * Cout,), dtype=jnp.float32)
    running_mean = 0.1 * jax.random.normal(km, (Cout,), dtype=jnp.float32)
    running_var = jax.random.uniform(kv, (Cout,), jnp.float32, 0.5, 1.5)
    conv_bias = None   # module default: bias=False

    out = conv2d_crelu_pallas(x, weight, conv_bias, running_mean, running_var,
                              alpha, beta, stride=stride, same_padding=same_padding)
    out = jax.block_until_ready(out)

    ref = _reference_conv2d_crelu(x, weight, conv_bias, running_mean, running_var,
                                  alpha, beta, stride=stride,
                                  same_padding=same_padding)
    assert out.shape == (B, 2 * Cout, H, W), out.shape
    max_err = float(jnp.max(jnp.abs(out - ref)))
    # bf16 MXU inputs + bf16 output store (f32 accumulate/epilogue) -> bf16-level tolerance.
    assert jnp.allclose(out, ref, atol=4e-2, rtol=4e-2), f"mismatch vs reference: {max_err}"
    print("KERNEL_OK")
</pallas_src>

<mosaic_0001>
module attributes {stable_mosaic.version = 11 : i64} {
  func.func @_crelu_gemm_kernel(%arg0: i32, %arg1: i32, %arg2: memref<1x16x16x128xbf16, #tpu.memory_space<vmem>>, %arg3: memref<128x16xbf16, #tpu.memory_space<vmem>>, %arg4: memref<1x16xf32, #tpu.memory_space<vmem>>, %arg5: memref<1x16xf32, #tpu.memory_space<vmem>>, %arg6: memref<1x16x16x16xbf16, #tpu.memory_space<vmem>>) attributes {dimension_semantics = [#tpu.dimension_semantics<parallel>, #tpu.dimension_semantics<parallel>], iteration_bounds = array<i64: 2, 1>, scalar_prefetch = 0 : i64, scratch_operands = 0 : i64, tpu.core_type = #tpu.core_type<tc>, window_params = [{transform_indices = @transform_0, window_bounds = array<i64: 1, 16, 16, 128>}, {pipeline_mode = #tpu.pipeline_mode<synchronous>, transform_indices = @transform_1, window_bounds = array<i64: 128, 16>}, {pipeline_mode = #tpu.pipeline_mode<synchronous>, transform_indices = @transform_2, window_bounds = array<i64: 1, 16>}, {pipeline_mode = #tpu.pipeline_mode<synchronous>, transform_indices = @transform_3, window_bounds = array<i64: 1, 16>}, {transform_indices = @transform_4, window_bounds = array<i64: 1, 16, 16, 16>}]} {
    %c0 = arith.constant 0 : index
    %c0_0 = arith.constant 0 : index
    %c0_1 = arith.constant 0 : index
    %c0_2 = arith.constant 0 : index
    %0 = vector.load %arg2[%c0, %c0_0, %c0_1, %c0_2] : memref<1x16x16x128xbf16, #tpu.memory_space<vmem>>, vector<1x16x16x128xbf16>
    %1 = vector.shape_cast %0 : vector<1x16x16x128xbf16> to vector<16x16x128xbf16>
    %2 = vector.shape_cast %1 : vector<16x16x128xbf16> to vector<256x128xbf16>
    %c0_3 = arith.constant 0 : index
    %c0_4 = arith.constant 0 : index
    %3 = vector.load %arg3[%c0_3, %c0_4] : memref<128x16xbf16, #tpu.memory_space<vmem>>, vector<128x16xbf16>
    %cst = arith.constant dense<0.000000e+00> : vector<256x16xf32>
    %4 = tpu.matmul %2, %3, %cst {dimension_numbers = #tpu.dot_dimension_numbers<[1], [0], [0], [1], [0, 0, 1, 1], [], []>} : vector<256x128xbf16>, vector<128x16xbf16>, vector<256x16xf32> -> vector<256x16xf32>
    %c0_5 = arith.constant 0 : index
    %c0_6 = arith.constant 0 : index
    %5 = vector.load %arg4[%c0_5, %c0_6] : memref<1x16xf32, #tpu.memory_space<vmem>>, vector<1x16xf32>
    %6 = vector.broadcast %5 : vector<1x16xf32> to vector<256x16xf32>
    %7 = arith.mulf %4, %6 : vector<256x16xf32>
    %c0_7 = arith.constant 0 : index
    %c0_8 = arith.constant 0 : index
    %8 = vector.load %arg5[%c0_7, %c0_8] : memref<1x16xf32, #tpu.memory_space<vmem>>, vector<1x16xf32>
    %9 = vector.broadcast %8 : vector<1x16xf32> to vector<256x16xf32>
    %10 = arith.addf %7, %9 : vector<256x16xf32>
    %cst_9 = arith.constant 0.000000e+00 : f32
    %11 = vector.broadcast %cst_9 : f32 to vector<256x16xf32>
    %12 = arith.maximumf %10, %11 : vector<256x16xf32>
    %13 = vector.shape_cast %12 : vector<256x16xf32> to vector<16x16x16xf32>
    %14 = arith.truncf %13 : vector<16x16x16xf32> to vector<16x16x16xbf16>
    %c0_10 = arith.constant 0 : index
    %c0_11 = arith.constant 0 : index
    %c0_12 = arith.constant 0 : index
    %c0_13 = arith.constant 0 : index
    %15 = vector.load %arg6[%c0_10, %c0_11, %c0_12, %c0_13] : memref<1x16x16x16xbf16, #tpu.memory_space<vmem>>, vector<1x16x16x16xbf16>
    %16 = vector.shape_cast %15 : vector<1x16x16x16xbf16> to vector<16x16x16xbf16>
    %17 = vector.shape_cast %14 : vector<16x16x16xbf16> to vector<1x16x16x16xbf16>
    tpu.vector_store %arg6[%c0_10, %c0_11, %c0_12, %c0_13], %17 {strides = array<i32>} : memref<1x16x16x16xbf16, #tpu.memory_space<vmem>>, vector<1x16x16x16xbf16>,
    return
  }
  func.func @transform_0(%arg0: i32, %arg1: i32) -> (i32, i32, i32, i32) {
    %c0_i32 = arith.constant 0 : i32
    %c0_i32_0 = arith.constant 0 : i32
    %c0_i32_1 = arith.constant 0 : i32
    return %arg0, %arg1, %c0_i32, %c0_i32_0 : i32, i32, i32, i32
  }
  func.func @transform_1(%arg0: i32, %arg1: i32) -> (i32, i32) {
    %c0_i32 = arith.constant 0 : i32
    %c0_i32_0 = arith.constant 0 : i32
    %c0_i32_1 = arith.constant 0 : i32
    return %c0_i32, %c0_i32_0 : i32, i32
  }
  func.func @transform_2(%arg0: i32, %arg1: i32) -> (i32, i32) {
    %c0_i32 = arith.constant 0 : i32
    %c0_i32_0 = arith.constant 0 : i32
    %c0_i32_1 = arith.constant 0 : i32
    return %c0_i32, %c0_i32_0 : i32, i32
  }
  func.func @transform_3(%arg0: i32, %arg1: i32) -> (i32, i32) {
    %c0_i32 = arith.constant 0 : i32
    %c0_i32_0 = arith.constant 0 : i32
    %c0_i32_1 = arith.constant 0 : i32
    return %c0_i32, %c0_i32_0 : i32, i32
  }
  func.func @transform_4(%arg0: i32, %arg1: i32) -> (i32, i32, i32, i32) {
    %c0_i32 = arith.constant 0 : i32
    %c0_i32_0 = arith.constant 0 : i32
    %c0_i32_1 = arith.constant 0 : i32
    return %arg0, %arg1, %c0_i32, %c0_i32_0 : i32, i32, i32, i32
  }
}

</mosaic_0001>

<bundles_post_ra>
// kernel: tpu_custom_call.1
= control target key start
LH: loop header
LB: loop body
LE: loop exit
PB: predicated region body
PF: predicated region fallthrough
CT: control target
= control target key end

     0   :  { %9 = vsyncpa [#allocation3], 0  ;;  %s1758_s0 = inlined_call_operand.hbm [shape: bf16[2,16,16,128], index: 0, kind: input, shape index: {}]   ;;  %s1759_s1 = inlined_call_operand.vmem [shape: bf16[128,16], index: 1, kind: input, shape index: {}]   ;;  %s1760_s2 = inlined_call_operand.vmem [shape: f32[1,16], index: 2, kind: input, shape index: {}]   ;;  %s1761_s3 = inlined_call_operand.vmem [shape: f32[1,16], index: 3, kind: input, shape index: {}]   ;;  %s1762_s4 = inlined_call_operand.hbm [shape: bf16[2,16,16,16], index: 4, kind: output, shape index: {}]  }
   0x1   :  { %11 = vsyncpa [#allocation3 + $0x1], 0 }
   0x2   :  { %12 = vsyncpa [#allocation4], 0 }
   0x3   :  { %14 = vsyncpa [#allocation4 + $0x1], 0  ;;  %s1396_s15 = smov 0   ;;  %s1398_s16 = smov 0  }
   0x4   :  { %s1400_s17 = smov 0   ;;  %s1402_s18 = smov 0  }
   0x5   :  { %s1404_s19 = smov 0   ;;  %s1406_s20 = smov 0  }
   0x6 LB: > { %s966_s21 = sadd.s32 4294967295, %s1363_s20   ;;  %s967_s22 = sadd.s32 4294967294, %s1363_s20   ;;  %s1363_s20 = sphi %s1406_s20, %s20_s20   ;;  %s1359_s19 = sphi %s1404_s19, %s1777_s19   ;;  %s1355_s18 = sphi %s1402_s18, %s1776_s18   ;;  %s1351_s17 = sphi %s1400_s17, %s1775_s17   ;;  %s1347_s16 = sphi %s1398_s16, %s1774_s16   ;;  %s1343_s15 = sphi %s1396_s15, %s1773_s15  }
   0x7   : > { %s32_s23 = sadd.s32 1, %s1359_s19  ;;  %s41_s24 = sadd.s32 1, %s1351_s17 }
   0x8   : > { %p34_p0 = scmp.ge.s32.totalorder %s32_s23, 2  ;;  %p48_p1 = scmp.ne.s32.totalorder %s1351_s17, %s1347_s16 }
   0x9   : > { %p49_p2 = scmp.eq.s32.totalorder %s1363_s20, 0  ;;  %p54_p3 = scmp.ne.s32.totalorder %s1347_s16, %s1343_s15 }
   0xa   : > { %s1779_s23 = smov (%p34_p0, %s32_s23), 0  ;;  %p55_p5 = scmp.eq.s32.totalorder %s966_s21, 0 }
   0xb   : > { %p1437_p4 = por %p49_p2, %p48_p1  ;;  %s36_s26 = ssub.s32 %s1359_s19, %s1779_s23 }
   0xc   : > { %p143_p6 = scmp.eq.s32.totalorder %s966_s21, 1  ;;  %p39_p7 = scmp.eq.s32.totalorder %s36_s26, 0 }
   0xd   : > { %p1443_p8 = por %p55_p5, %p54_p3  ;;  %p149_p10 = scmp.eq.s32.totalorder %s967_s22, 1 }
   0xe   : > { %p1447_p9 = por %p143_p6, %p48_p1  ;;  %p1173_p13 = scmp.lt.s32.totalorder %s1363_s20, 2 }
   0xf   : > { %s1452_s29 = scalar_select %p39_p7, %s1351_s17, %s41_s24  }
  0x10   : > { %s1766_s28 = scalar_select %p1447_p9, 1, 0 }
  0x11   : > { %p1454_p11 = por %p149_p10, %p54_p3  ;;  %s178_s5 = sand.u32 1, %s1351_s17  }
  0x12   : > { %s970_s6 = sshll.u32 %s178_s5, 7  ;;  %s1039_s7 = sshll.u32 %s1359_s19, 11 }
  0x13   : > { %s1767_s30 = scalar_select %p1454_p11, 1, 0 }
  0x14   : > { %s1465_s10 = scalar_lea.hbm %s1758_s0, %s1039_s7  ;;  %s182_s11 = scalar_lea.vmem [#allocation2], %s970_s6 }
  0x15   : > { %s192_s12 = sshll.u32 %s182_s11, 4  ;;  %p1471_p0 = pnand %p1173_p13, %p1437_p4  ;;  %s1467_s12 = int_to_ptr.vmem [resolvable:$true] %s192_s12 }
  0x16   : > { %s1476_s14 = scalar_lea.sflag [#allocation3], %s178_s5  ;;  %s1251_s21 = scalar_lea.hbm %s1465_s10, 2048 }
  0x17   : > { %p1252_p2 = scmp.ne.s32.totalorder %s1465_s10, %s1251_s21  ;;  %p1253_p3 = pneg %p1471_p0 }
  0x18   : > { %s1256_s25 = scalar_lea.hbm %s1758_s0, 4096  ;;  %p1257_p4 = scmp.lt.u32.totalorder %s1465_s10, %s1758_s0 }
  0x19   : > { %p1254_p5 = pnand %p1253_p3, %p1252_p2  ;;  %p1258_p7 = scmp.lt.u32.totalorder %s1256_s25, %s1251_s21 }
  0x1a   : > { %p1260_p13 = scmp.lt.u32.totalorder %s1251_s21, %s1465_s10 }
  0x1b   : > { %p1255_p6 = pneg %p1254_p5  ;;  %p1259_p10 = por %p1258_p7, %p1257_p4 }
  0x1d   : > { %p1261_p12 = por %p1260_p13, %p1259_p10 }
  0x1f   : > { %p1262_p1 = pnand %p1261_p12, %p1255_p6 }
  0x21   : > { %1265 = shalt.err (!%p1262_p1)
}
  0x22   : > { %s1266_s5 = scalar_lea.vmem %s1467_s12, 2048  ;;  %s1365_s7 = smov [#allocation2]  }
  0x23   : > { %p1267_p2 = scmp.ne.s32.totalorder %s1467_s12, %s1266_s5  ;;  %s1271_s8 = sshll.u32 %s1365_s7, 4  ;;  %s1272_s8 = int_to_ptr.vmem [resolvable:$false] %s1271_s8 }
  0x24   : > { %s1273_s9 = scalar_lea.vmem %s1272_s8, 4096  ;;  %p1274_p9 = scmp.lt.s32.totalorder %s1467_s12, %s1272_s8 }
  0x25   : > { %p1269_p5 = pnand %p1267_p2, %p1253_p3  ;;  %p1275_p4 = scmp.lt.s32.totalorder %s1273_s9, %s1266_s5 }
  0x27   : > { %p1270_p11 = pneg %p1269_p5  ;;  %p1276_p7 = por %p1275_p4, %p1274_p9 }
  0x29   : > { %p1277_p10 = pnand %p1276_p7, %p1270_p11 }
  0x2b   : > { %1280 = shalt.err (!%p1277_p10)
}
  0x2c   : > { %s1366_s11 = smov 64   ;;  %s1367_s21 = smov 4  }
  0x2d   : > { %1168 = dma.hbm_to_vmem [thread:$0]  (!%p1471_p0), %s1465_s10, 2048, %s1467_s12, %s1476_s14, %s1366_s11, %s1366_s11, %s1367_s21  }
  0x2e   : > { %p200_p12 = scmp.lt.s32.totalorder %s1363_s20, 3  ;;  %p1769_p1 = scmp.ge.s32.totalorder %s1363_s20, 1 }
  0x30   : > { %p201_p3 = pnand %p1769_p1, %p200_p12 }
  0x31   : > { %s1508_s22 = sand.u32 (!%p201_p3), 1, %s1347_s16  }
  0x32   : > { %204 = sbr.rel (%p201_p3) target bundleno = 356 (0x164), region = 36  ;;  %s974_s24 = sshll.u32 (!%p201_p3), %s1508_s22, 7 }
  0x33   : > { %s207_s25 = scalar_lea.sflag (!%p201_p3), [#allocation3], %s1508_s22  ;;  %s1514_s26 = scalar_lea.vmem (!%p201_p3), [#allocation2], %s974_s24 }
  0x39   : > { %1334 = dma.done.wait (%p1443_p8), %s207_s25, 2048  }
  0x3a   : > { %1336 = vsyncadd (%p1443_p8), %s207_s25, 4294965248  ;;  %v1227_v0 = vld [vmem:[%s1759_s1] sm:$0xff]   ;;  %v1228_v1 = vld [vmem:[%s1759_s1 + $0x8] sm:$0xff]   ;;  %vm829_vm0 = vcmask 125952   ;;  %s863_s11 = scalar_lea.sflag [#allocation4], %s1508_s22  ;;  %p1770_p9 = scmp.ne.s32.totalorder %s1766_s28, 0 }
  0x3b   : > { %1097 = vmatprep.subr.bf16.mxu0 %v1227_v0  ;;  %1145 = vmatprep.subr.bf16.mxu1 %v1227_v0  ;;  %v1229_v2 = vld [vmem:[%s1759_s1 + $0x10] sm:$0xff]   ;;  %v1230_v3 = vld [vmem:[%s1759_s1 + $0x18] sm:$0xff]   ;;  %v1235_v4 = vld [vmem:[%s1514_s26] sm:$0xff]   ;;  %s1368_s25 = smov [#allocation5]  }
  0x3c   : > { %1098 = vmatpush3.bf16.msra.mxu0 %v1227_v0  ;;  %1153 = vmatpush3.bf16.msra.mxu1 %v1227_v0  ;;  %v1236_v5 = vld [vmem:[%s1514_s26 + $0x40] sm:$0xff]   ;;  %v1232_v7 = vld [vmem:[%s1759_s1 + $0x28] sm:$0xff]   ;;  %v1233_v8 = vld [vmem:[%s1759_s1 + $0x30] sm:$0xff]   ;;  %s1285_s10 = sshll.u32 %s1368_s25, 4  ;;  %s1286_s10 = int_to_ptr.vmem [resolvable:$false] %s1285_s10 }
  0x3d   : > { %1099 = vmatprep.subr.bf16.mxu0 %v1228_v1  ;;  %1146 = vmatprep.subr.bf16.mxu1 %v1228_v1  ;;  %v1231_v6 = vld [vmem:[%s1759_s1 + $0x20] sm:$0xff]   ;;  %v1234_v9 = vld [vmem:[%s1759_s1 + $0x38] sm:$0xff]   ;;  %v1237_v10 = vld [vmem:[%s1514_s26 + $0x8] sm:$0xff]   ;;  %s1287_s12 = scalar_lea.vmem %s1286_s10, 4096 }
  0x3e   : > { %1113 = vmatprep.mubr.bf16.mxu0 %v1235_v4  ;;  %1129 = vmatprep.mubr.bf16.mxu1 %v1236_v5  ;;  %v1238_v11 = vld [vmem:[%s1514_s26 + $0x48] sm:$0xff]   ;;  %v1239_v12 = vld [vmem:[%s1514_s26 + $0x10] sm:$0xff]   ;;  %v1241_v14 = vld [vmem:[%s1514_s26 + $0x18] sm:$0xff]  }
  0x3f   : > { %v1240_v13 = vld [vmem:[%s1514_s26 + $0x50] sm:$0xff]   ;;  %v1242_v15 = vld [vmem:[%s1514_s26 + $0x58] sm:$0xff]   ;;  %v1243_v16 = vld [vmem:[%s1514_s26 + $0x20] sm:$0xff]  }
  0x40   : > { %1100 = vmatpush3.bf16.msra.mxu0 %v1228_v1  ;;  %1154 = vmatpush3.bf16.msra.mxu1 %v1228_v1  ;;  %v1244_v17 = vld [vmem:[%s1514_s26 + $0x60] sm:$0xff]   ;;  %v1245_v18 = vld [vmem:[%s1514_s26 + $0x28] sm:$0xff]   ;;  %v1247_v20 = vld [vmem:[%s1514_s26 + $0x30] sm:$0xff]  }
  0x41   : > { %1101 = vmatprep.subr.bf16.mxu0 %v1229_v2  ;;  %1147 = vmatprep.subr.bf16.mxu1 %v1229_v2  ;;  %v1246_v19 = vld [vmem:[%s1514_s26 + $0x68] sm:$0xff]   ;;  %v1248_v21 = vld [vmem:[%s1514_s26 + $0x70] sm:$0xff]   ;;  %v1249_v22 = vld [vmem:[%s1514_s26 + $0x38] sm:$0xff]  }
  0x42   : > { %v1250_v23 = vld [vmem:[%s1514_s26 + $0x78] sm:$0xff]   ;;  %v1563_v24 = vld [vmem:[%s1760_s2] ss:$0 sm:$0xff]  ;;  %s1588_s26 = scalar_lea.vmem [#allocation5], %s974_s24  ;;  %s1072_s24 = sshll.u32 %s1355_s18, 11 }
  0x43   : > { %v1568_v26 = vld [vmem:[%s1761_s3] ss:$0 sm:$0xff]  ;;  %s879_s7 = sshll.u32 %s1588_s26, 4  ;;  %s1695_s9 = scalar_lea.hbm %s1762_s4, %s1072_s24  ;;  %s1697_s7 = int_to_ptr.vmem [resolvable:$true] %s879_s7 }
  0x44   : > { %1102 = vmatpush3.bf16.msra.mxu0 %v1229_v2  ;;  %1155 = vmatpush3.bf16.msra.mxu1 %v1229_v2  ;;  %s1281_s21 = scalar_lea.vmem %s1697_s7, 2048  ;;  %p1288_p6 = scmp.lt.s32.totalorder %s1697_s7, %s1286_s10 }
  0x45   : > { %1103 = vmatprep.subr.bf16.mxu0 %v1230_v3  ;;  %1148 = vmatprep.subr.bf16.mxu1 %v1230_v3  ;;  %p1282_p8 = scmp.ne.s32.totalorder %s1697_s7, %s1281_s21  ;;  %p1289_p13 = scmp.lt.s32.totalorder %s1287_s12, %s1281_s21 }
  0x47   : > { %p1283_p11 = pnand %p1282_p8, %p1770_p9  ;;  %p1290_p2 = por %p1289_p13, %p1288_p6 }
  0x48   : > { %1104 = vmatpush3.bf16.msra.mxu0 %v1230_v3  ;;  %1156 = vmatpush3.bf16.msra.mxu1 %v1230_v3 }
  0x49   : > { %1105 = vmatprep.subr.bf16.mxu0 %v1231_v6  ;;  %1149 = vmatprep.subr.bf16.mxu1 %v1231_v6  ;;  %p1284_p0 = pneg %p1283_p11 }
  0x4b   : > { %p1291_p5 = pnand %p1290_p2, %p1284_p0 }
  0x4c   : > { %1106 = vmatpush3.bf16.msra.mxu0 %v1231_v6  ;;  %1157 = vmatpush3.bf16.msra.mxu1 %v1231_v6 }
  0x4d   : > { %1107 = vmatprep.subr.bf16.mxu0 %v1232_v7  ;;  %1150 = vmatprep.subr.bf16.mxu1 %v1232_v7 }
  0x50   : > { %1108 = vmatpush3.bf16.msra.mxu0 %v1232_v7  ;;  %1158 = vmatpush3.bf16.msra.mxu1 %v1232_v7 }
  0x51   : > { %1109 = vmatprep.subr.bf16.mxu0 %v1233_v8  ;;  %1151 = vmatprep.subr.bf16.mxu1 %v1233_v8 }
  0x54   : > { %1110 = vmatpush3.bf16.msra.mxu0 %v1233_v8  ;;  %1159 = vmatpush3.bf16.msra.mxu1 %v1233_v8 }
  0x55   : > { %1111 = vmatprep.subr.bf16.mxu0 %v1234_v9  ;;  %1152 = vmatprep.subr.bf16.mxu1 %v1234_v9 }
  0x58   : > { %1112 = vmatpush3.bf16.msra.mxu0 %v1234_v9  ;;  %1160 = vmatpush3.bf16.msra.mxu1 %v1234_v9 }
  0x5b   : > { %1114 = vmatmul.mubr.bf16.vlgmr.msra.gmra.mrb[0].mxu0 %v1237_v10  ;;  %1130 = vmatmul.mubr.bf16.vlgmr.msra.gmra.mrb[0].mxu1 %v1238_v11 }
  0x5c   : > { %1117 = vmatprep.mubr.bf16.mxu0 %v1239_v12  ;;  %1133 = vmatprep.mubr.bf16.mxu1 %v1240_v13 }
  0x63   : > { %1118 = vmatmul.mubr.bf16.gmra.mrb[4].mxu0 %v1241_v14  ;;  %1134 = vmatmul.mubr.bf16.gmra.mrb[4].mxu1 %v1242_v15 }
  0x64   : > { %1121 = vmatprep.mubr.bf16.mxu0 %v1243_v16  ;;  %1137 = vmatprep.mubr.bf16.mxu1 %v1244_v17 }
  0x6b   : > { %1122 = vmatmul.mubr.bf16.gmra.mrb[8].mxu0 %v1245_v18  ;;  %1138 = vmatmul.mubr.bf16.gmra.mrb[8].mxu1 %v1246_v19 }
  0x6c   : > { %1125 = vmatprep.mubr.bf16.mxu0 %v1247_v20  ;;  %1141 = vmatprep.mubr.bf16.mxu1 %v1248_v21 }
  0x73   : > { %1126 = vmatmul.mubr.bf16.gmra.mrb[12].mxu0 %v1249_v22  ;;  %1142 = vmatmul.mubr.bf16.gmra.mrb[12].mxu1 %v1250_v23 }
 0x12e   : > { %v1115_v25 = vpop.f32.mrb[0].mxu0  ;;  %v1131_v27 = vpop.f32.mrb[0].mxu1 }
 0x12f   : > { %v600_v28 = vmul.f32 %v1115_v25, %v1563_v24  ;;  %v616_v29 = vmul.f32 %v1131_v27, %v1563_v24  ;;  %v464_v30 = vpop.f32.mrb[1].mxu0  ;;  %v528_v31 = vpop.f32.mrb[1].mxu1 }
 0x130   : > { %v598_v32 = vmul.f32 %v1563_v24, %v464_v30  ;;  %v614_v33 = vmul.f32 %v1563_v24, %v528_v31  ;;  %v1116_v34 = vpop.f32.mrb[2].mxu0  ;;  %v1132_v35 = vpop.f32.mrb[2].mxu1 }
 0x131   : > { %v639_v36 = vadd.f32 %v1568_v26, %v600_v28  ;;  %v655_v37 = vadd.f32 %v1568_v26, %v616_v29  ;;  %v601_v38 = vmul.f32 %v1116_v34, %v1563_v24  ;;  %v617_v39 = vmul.f32 %v1132_v35, %v1563_v24  ;;  %v467_v40 = vpop.f32.mrb[3].mxu0  ;;  %v531_v41 = vpop.f32.mrb[3].mxu1 }
 0x132   : > { %v637_v42 = vadd.f32 %v1568_v26, %v598_v32  ;;  %v653_v43 = vadd.f32 %v1568_v26, %v614_v33  ;;  %v599_v44 = vmul.f32 %v1563_v24, %v467_v40  ;;  %v615_v45 = vmul.f32 %v1563_v24, %v531_v41 }
 0x133   : > { %v671_v46 = vmax.f32 %v639_v36, 0.0  ;;  %v687_v47 = vmax.f32 %v655_v37, 0.0  ;;  %v640_v48 = vadd.f32 %v1568_v26, %v601_v38  ;;  %v656_v49 = vadd.f32 %v1568_v26, %v617_v39 }
 0x134   : > { %v669_v50 = vmax.f32 %v637_v42, 0.0  ;;  %v685_v51 = vmax.f32 %v653_v43, 0.0  ;;  %v638_v52 = vadd.f32 %v1568_v26, %v599_v44  ;;  %v654_v53 = vadd.f32 %v1568_v26, %v615_v45 }
 0x135   : > { %v1042_v54 = vpack.c.bf16 %v671_v46, %v671_v46  ;;  %v1058_v55 = vpack.c.bf16 %v687_v47, %v687_v47  ;;  %v672_v56 = vmax.f32 %v640_v48, 0.0  ;;  %v688_v57 = vmax.f32 %v656_v49, 0.0 }
 0x136   : > { %v1040_v58 = vpack.c.bf16 %v669_v50, %v669_v50  ;;  %v1056_v59 = vpack.c.bf16 %v685_v51, %v685_v51  ;;  %v670_v60 = vmax.f32 %v638_v52, 0.0  ;;  %v686_v61 = vmax.f32 %v654_v53, 0.0  ;;  %v1119_v62 = vpop.f32.mrb[4].mxu0  ;;  %v1135_v63 = vpop.f32.mrb[4].mxu1 }
 0x137   : > { %832 = vst.msk [vmem:[%s1588_s26 + $0x8] sm:$0xf] %vm829_vm0, %v1042_v54  ;;  %848 = vst.msk [vmem:[%s1588_s26 + $0x48] sm:$0xf] %vm829_vm0, %v1058_v55  ;;  %v1043_v0 = vpack.c.bf16 %v672_v56, %v672_v56  ;;  %v1059_v1 = vpack.c.bf16 %v688_v57, %v688_v57  ;;  %v604_v2 = vmul.f32 %v1119_v62, %v1563_v24  ;;  %v480_v4 = vpop.f32.mrb[5].mxu0  ;;  %v544_v5 = vpop.f32.mrb[5].mxu1 }
 0x138   : > { %v620_v3 = vmul.f32 %v1135_v63, %v1563_v24  ;;  %830 = vst.msk [vmem:[%s1588_s26] sm:$0xf] %vm829_vm0, %v1040_v58  ;;  %846 = vst.msk [vmem:[%s1588_s26 + $0x40] sm:$0xf] %vm829_vm0, %v1056_v59  ;;  %v1041_v6 = vpack.c.bf16 %v670_v60, %v670_v60  ;;  %v1057_v7 = vpack.c.bf16 %v686_v61, %v686_v61  ;;  %v1120_v10 = vpop.f32.mrb[6].mxu0  ;;  %v1136_v11 = vpop.f32.mrb[6].mxu1 }
 0x139   : > { %v602_v8 = vmul.f32 %v1563_v24, %v480_v4  ;;  %v618_v9 = vmul.f32 %v1563_v24, %v544_v5  ;;  %833 = vst.msk [vmem:[%s1588_s26 + $0xc] sm:$0xf] %vm829_vm0, %v1043_v0  ;;  %849 = vst.msk [vmem:[%s1588_s26 + $0x4c] sm:$0xf] %vm829_vm0, %v1059_v1  ;;  %v643_v12 = vadd.f32 %v1568_v26, %v604_v2  ;;  %v483_v16 = vpop.f32.mrb[7].mxu0  ;;  %v547_v17 = vpop.f32.mrb[7].mxu1 }
 0x13a   : > { %v659_v13 = vadd.f32 %v1568_v26, %v620_v3  ;;  %v605_v14 = vmul.f32 %v1120_v10, %v1563_v24  ;;  %v621_v15 = vmul.f32 %v1136_v11, %v1563_v24  ;;  %831 = vst.msk [vmem:[%s1588_s26 + $0x4] sm:$0xf] %vm829_vm0, %v1041_v6  ;;  %847 = vst.msk [vmem:[%s1588_s26 + $0x44] sm:$0xf] %vm829_vm0, %v1057_v7 }
 0x13b   : > { %v641_v18 = vadd.f32 %v1568_v26, %v602_v8  ;;  %v657_v19 = vadd.f32 %v1568_v26, %v618_v9  ;;  %v603_v20 = vmul.f32 %v1563_v24, %v483_v16  ;;  %v619_v21 = vmul.f32 %v1563_v24, %v547_v17 }
 0x13c   : > { %v675_v22 = vmax.f32 %v643_v12, 0.0  ;;  %v691_v23 = vmax.f32 %v659_v13, 0.0  ;;  %v644_v25 = vadd.f32 %v1568_v26, %v605_v14  ;;  %v660_v27 = vadd.f32 %v1568_v26, %v621_v15 }
 0x13d   : > { %v673_v28 = vmax.f32 %v641_v18, 0.0  ;;  %v689_v29 = vmax.f32 %v657_v19, 0.0  ;;  %v642_v30 = vadd.f32 %v1568_v26, %v603_v20  ;;  %v658_v31 = vadd.f32 %v1568_v26, %v619_v21 }
 0x13e   : > { %v1046_v32 = vpack.c.bf16 %v675_v22, %v675_v22  ;;  %v1062_v33 = vpack.c.bf16 %v691_v23, %v691_v23  ;;  %v676_v34 = vmax.f32 %v644_v25, 0.0  ;;  %v692_v35 = vmax.f32 %v660_v27, 0.0  ;;  %v1123_v40 = vpop.f32.mrb[8].mxu0  ;;  %v1139_v41 = vpop.f32.mrb[8].mxu1 }
 0x13f   : > { %v1044_v36 = vpack.c.bf16 %v673_v28, %v673_v28  ;;  %v1060_v37 = vpack.c.bf16 %v689_v29, %v689_v29  ;;  %v674_v38 = vmax.f32 %v642_v30, 0.0  ;;  %v690_v39 = vmax.f32 %v658_v31, 0.0  ;;  %v496_v46 = vpop.f32.mrb[9].mxu0  ;;  %v560_v47 = vpop.f32.mrb[9].mxu1 }
 0x140   : > { %836 = vst.msk [vmem:[%s1588_s26 + $0x18] sm:$0xf] %vm829_vm0, %v1046_v32  ;;  %852 = vst.msk [vmem:[%s1588_s26 + $0x58] sm:$0xf] %vm829_vm0, %v1062_v33  ;;  %v1047_v42 = vpack.c.bf16 %v676_v34, %v676_v34  ;;  %v1063_v43 = vpack.c.bf16 %v692_v35, %v692_v35  ;;  %v608_v44 = vmul.f32 %v1123_v40, %v1563_v24  ;;  %v1124_v52 = vpop.f32.mrb[10].mxu0  ;;  %v1140_v53 = vpop.f32.mrb[10].mxu1 }
 0x141   : > { %v624_v45 = vmul.f32 %v1139_v41, %v1563_v24  ;;  %834 = vst.msk [vmem:[%s1588_s26 + $0x10] sm:$0xf] %vm829_vm0, %v1044_v36  ;;  %850 = vst.msk [vmem:[%s1588_s26 + $0x50] sm:$0xf] %vm829_vm0, %v1060_v37  ;;  %v1045_v48 = vpack.c.bf16 %v674_v38, %v674_v38  ;;  %v1061_v49 = vpack.c.bf16 %v690_v39, %v690_v39  ;;  %v499_v58 = vpop.f32.mrb[11].mxu0  ;;  %v563_v59 = vpop.f32.mrb[11].mxu1 }
 0x142   : > { %v606_v50 = vmul.f32 %v1563_v24, %v496_v46  ;;  %v622_v51 = vmul.f32 %v1563_v24, %v560_v47  ;;  %837 = vst.msk [vmem:[%s1588_s26 + $0x1c] sm:$0xf] %vm829_vm0, %v1047_v42  ;;  %853 = vst.msk [vmem:[%s1588_s26 + $0x5c] sm:$0xf] %vm829_vm0, %v1063_v43  ;;  %v647_v54 = vadd.f32 %v1568_v26, %v608_v44 }
 0x143   : > { %v663_v55 = vadd.f32 %v1568_v26, %v624_v45  ;;  %v609_v56 = vmul.f32 %v1124_v52, %v1563_v24  ;;  %v625_v57 = vmul.f32 %v1140_v53, %v1563_v24  ;;  %835 = vst.msk [vmem:[%s1588_s26 + $0x14] sm:$0xf] %vm829_vm0, %v1045_v48  ;;  %851 = vst.msk [vmem:[%s1588_s26 + $0x54] sm:$0xf] %vm829_vm0, %v1061_v49 }
 0x144   : > { %v645_v60 = vadd.f32 %v1568_v26, %v606_v50  ;;  %v661_v61 = vadd.f32 %v1568_v26, %v622_v51  ;;  %v607_v62 = vmul.f32 %v1563_v24, %v499_v58  ;;  %v623_v63 = vmul.f32 %v1563_v24, %v563_v59 }
 0x145   : > { %v679_v0 = vmax.f32 %v647_v54, 0.0  ;;  %v695_v1 = vmax.f32 %v663_v55, 0.0  ;;  %v648_v2 = vadd.f32 %v1568_v26, %v609_v56  ;;  %v664_v3 = vadd.f32 %v1568_v26, %v625_v57 }
 0x146   : > { %v677_v4 = vmax.f32 %v645_v60, 0.0  ;;  %v693_v5 = vmax.f32 %v661_v61, 0.0  ;;  %v646_v6 = vadd.f32 %v1568_v26, %v607_v62  ;;  %v662_v7 = vadd.f32 %v1568_v26, %v623_v63  ;;  %v1127_v16 = vpop.f32.mrb[12].mxu0  ;;  %v1143_v17 = vpop.f32.mrb[12].mxu1 }
 0x147   : > { %v1050_v8 = vpack.c.bf16 %v679_v0, %v679_v0  ;;  %v1066_v9 = vpack.c.bf16 %v695_v1, %v695_v1  ;;  %v680_v10 = vmax.f32 %v648_v2, 0.0  ;;  %v696_v11 = vmax.f32 %v664_v3, 0.0  ;;  %v512_v22 = vpop.f32.mrb[13].mxu0  ;;  %v576_v23 = vpop.f32.mrb[13].mxu1 }
 0x148   : > { %v1048_v12 = vpack.c.bf16 %v677_v4, %v677_v4  ;;  %v1064_v13 = vpack.c.bf16 %v693_v5, %v693_v5  ;;  %v678_v14 = vmax.f32 %v646_v6, 0.0  ;;  %v694_v15 = vmax.f32 %v662_v7, 0.0  ;;  %v1128_v30 = vpop.f32.mrb[14].mxu0  ;;  %v1144_v31 = vpop.f32.mrb[14].mxu1 }
 0x149   : > { %840 = vst.msk [vmem:[%s1588_s26 + $0x28] sm:$0xf] %vm829_vm0, %v1050_v8  ;;  %856 = vst.msk [vmem:[%s1588_s26 + $0x68] sm:$0xf] %vm829_vm0, %v1066_v9  ;;  %v1051_v18 = vpack.c.bf16 %v680_v10, %v680_v10  ;;  %v1067_v19 = vpack.c.bf16 %v696_v11, %v696_v11  ;;  %v612_v20 = vmul.f32 %v1127_v16, %v1563_v24  ;;  %v515_v36 = vpop.f32.mrb[15].mxu0  ;;  %v579_v37 = vpop.f32.mrb[15].mxu1 }
 0x14a   : > { %v628_v21 = vmul.f32 %v1143_v17, %v1563_v24  ;;  %838 = vst.msk [vmem:[%s1588_s26 + $0x20] sm:$0xf] %vm829_vm0, %v1048_v12  ;;  %854 = vst.msk [vmem:[%s1588_s26 + $0x60] sm:$0xf] %vm829_vm0, %v1064_v13  ;;  %v1049_v25 = vpack.c.bf16 %v678_v14, %v678_v14  ;;  %v1065_v27 = vpack.c.bf16 %v694_v15, %v694_v15 }
 0x14b   : > { %v610_v28 = vmul.f32 %v1563_v24, %v512_v22  ;;  %v626_v29 = vmul.f32 %v1563_v24, %v576_v23  ;;  %841 = vst.msk [vmem:[%s1588_s26 + $0x2c] sm:$0xf] %vm829_vm0, %v1051_v18  ;;  %857 = vst.msk [vmem:[%s1588_s26 + $0x6c] sm:$0xf] %vm829_vm0, %v1067_v19  ;;  %v651_v32 = vadd.f32 %v1568_v26, %v612_v20 }
 0x14c   : > { %v667_v33 = vadd.f32 %v1568_v26, %v628_v21  ;;  %v613_v34 = vmul.f32 %v1128_v30, %v1563_v24  ;;  %v629_v35 = vmul.f32 %v1144_v31, %v1563_v24  ;;  %839 = vst.msk [vmem:[%s1588_s26 + $0x24] sm:$0xf] %vm829_vm0, %v1049_v25  ;;  %855 = vst.msk [vmem:[%s1588_s26 + $0x64] sm:$0xf] %vm829_vm0, %v1065_v27 }
 0x14d   : > { %v649_v38 = vadd.f32 %v1568_v26, %v610_v28  ;;  %v665_v39 = vadd.f32 %v1568_v26, %v626_v29  ;;  %v611_v40 = vmul.f32 %v1563_v24, %v515_v36  ;;  %v627_v41 = vmul.f32 %v1563_v24, %v579_v37 }
 0x14e   : > { %v683_v42 = vmax.f32 %v651_v32, 0.0  ;;  %v699_v43 = vmax.f32 %v667_v33, 0.0  ;;  %v652_v44 = vadd.f32 %v1568_v26, %v613_v34  ;;  %v668_v45 = vadd.f32 %v1568_v26, %v629_v35 }
 0x14f   : > { %v681_v46 = vmax.f32 %v649_v38, 0.0  ;;  %v697_v47 = vmax.f32 %v665_v39, 0.0  ;;  %v650_v48 = vadd.f32 %v1568_v26, %v611_v40  ;;  %v666_v49 = vadd.f32 %v1568_v26, %v627_v41 }
 0x150   : > { %v1054_v50 = vpack.c.bf16 %v683_v42, %v683_v42  ;;  %v1070_v24 = vpack.c.bf16 %v699_v43, %v699_v43  ;;  %v684_v51 = vmax.f32 %v652_v44, 0.0  ;;  %v700_v52 = vmax.f32 %v668_v45, 0.0 }
 0x151   : > { %v1052_v53 = vpack.c.bf16 %v681_v46, %v681_v46  ;;  %v1068_v54 = vpack.c.bf16 %v697_v47, %v697_v47  ;;  %v682_v55 = vmax.f32 %v650_v48, 0.0  ;;  %v698_v56 = vmax.f32 %v666_v49, 0.0 }
 0x152   : > { %844 = vst.msk [vmem:[%s1588_s26 + $0x38] sm:$0xf] %vm829_vm0, %v1054_v50  ;;  %860 = vst.msk [vmem:[%s1588_s26 + $0x78] sm:$0xf] %vm829_vm0, %v1070_v24  ;;  %v1055_v26 = vpack.c.bf16 %v684_v51, %v684_v51  ;;  %v1071_v57 = vpack.c.bf16 %v700_v52, %v700_v52 }
 0x153   : > { %842 = vst.msk [vmem:[%s1588_s26 + $0x30] sm:$0xf] %vm829_vm0, %v1052_v53  ;;  %858 = vst.msk [vmem:[%s1588_s26 + $0x70] sm:$0xf] %vm829_vm0, %v1068_v54  ;;  %v1053_v58 = vpack.c.bf16 %v682_v55, %v682_v55  ;;  %v1069_v59 = vpack.c.bf16 %v698_v56, %v698_v56 }
 0x154   : > { %845 = vst.msk [vmem:[%s1588_s26 + $0x3c] sm:$0xf] %vm829_vm0, %v1055_v26  ;;  %861 = vst.msk [vmem:[%s1588_s26 + $0x7c] sm:$0xf] %vm829_vm0, %v1071_v57 }
 0x155   : > { %843 = vst.msk [vmem:[%s1588_s26 + $0x34] sm:$0xf] %vm829_vm0, %v1053_v58  ;;  %859 = vst.msk [vmem:[%s1588_s26 + $0x74] sm:$0xf] %vm829_vm0, %v1069_v59 }
 0x156   : > { %1294 = shalt.err (!%p1291_p5)
}
 0x157   : > { %s1295_s13 = scalar_lea.hbm %s1695_s9, 2048  ;;  %s1299_s5 = scalar_lea.hbm %s1762_s4, 4096 }
 0x158   : > { %p1296_p4 = scmp.ne.s32.totalorder %s1695_s9, %s1295_s13  ;;  %p1300_p12 = scmp.lt.u32.totalorder %s1695_s9, %s1762_s4 }
 0x159   : > { %p1301_p1 = scmp.lt.u32.totalorder %s1299_s5, %s1295_s13  ;;  %p1303_p8 = scmp.lt.u32.totalorder %s1295_s13, %s1695_s9 }
 0x15a   : > { %p1297_p7 = pnand %p1296_p4, %p1770_p9 }
 0x15b   : > { %p1302_p3 = por %p1301_p1, %p1300_p12 }
 0x15c   : > { %p1298_p10 = pneg %p1297_p7 }
 0x15d   : > { %p1304_p11 = por %p1303_p8, %p1302_p3 }
 0x15f   : > { %p1305_p0 = pnand %p1304_p11, %p1298_p10 }
 0x161   : > { %1308 = shalt.err (!%p1305_p0)
}
 0x162   : > { %s1369_s24 = smov 64   ;;  %s1370_s18 = smov 4  }
 0x163   : > { %1163 = dma.vmem_to_hbm [thread:$0]  (%p1770_p9), %s1697_s7, 2048, %s1695_s9, %s863_s11, %s1369_s24, %s1369_s24, %s1370_s18  }
 0x164 PF: > { %s894_s8 = sand.u32 1, %s1343_s15   ;;  %p1771_p6 = scmp.ne.s32.totalorder %s1767_s30, 0 }
 0x165   : > { %p1772_p13 = scmp.ge.s32.totalorder %s1363_s20, 2  ;;  %s895_s21 = scalar_lea.sflag [#allocation4], %s894_s8 }
 0x167   : > { %p1170_p2 = pnand %p1772_p13, %p1771_p6 }
 0x169   : > { %1338 = dma.done.wait (!%p1170_p2), %s895_s21, 2048  }
 0x16a   : > { %1340 = vsyncadd (!%p1170_p2), %s895_s21, 4294965248  ;;  %s20_s20 = sadd.s32 1, %s1363_s20   ;;  %s1773_s15 = smov %s1347_s16 }
 0x16b   : > { %p17_p5 = scmp.ge.s32.totalorder %s20_s20, 4   ;;  %s1774_s16 = smov %s1351_s17 }
 0x16c   : > { %s1775_s17 = smov %s1452_s29  ;;  %s1776_s18 = smov %s1359_s19 }
 0x16d   : > { %s1777_s19 = smov %s1779_s23  ;;  %19 = sbr.rel (!%p17_p5) target bundleno = 6 (0x6), region = 81 }
 0x174   :  { %900 = vsyncpa [#allocation3], 1 }
 0x175   :  { %902 = vsyncpa [#allocation3 + $0x1], 1 }
 0x176   :  { %903 = vsyncpa [#allocation4], 1 }
 0x177   :  { %905 = vsyncpa [#allocation4 + $0x1], 1 }

</bundles_post_ra>
